<compile_context>
chip_gen: v7x
topology: tpu7x:2x2x1
jax: 0.10.0
libtpu: 0.0.40
codegen_flags: <defaults>
</compile_context>

<pallas_src>
import math

import jax
import jax.numpy as jnp
from jax.experimental import pallas as pl
from jax.experimental.pallas import tpu as pltpu


# ------------------------------- helpers ------------------------------------


def _default_l1_dtype():
    """bf16 elementwise math only where the VPU supports it (v6e / v7x)."""
    try:
        kind = jax.devices()[0].device_kind.lower()
    except Exception:
        kind = ""
    if "v6" in kind or "v7" in kind:
        return jnp.bfloat16
    return jnp.float32


def _vmem_plan():
    """(vmem_limit_bytes, per-grid-step VMEM budget) scaled per generation."""
    cap = 128 * 1024 * 1024
    try:
        info = pltpu.get_tpu_info()
        cap = int(getattr(info, "vmem_capacity_bytes", cap))
    except Exception:
        pass
    if cap <= 64 * 1024 * 1024:
        # v7x-class: 64 MiB physical per TensorCore -> leave real headroom.
        return 36 * 1024 * 1024, 14 * 1024 * 1024
    # v5e / v6e: 128 MiB physical.
    return 96 * 1024 * 1024, 40 * 1024 * 1024


def _pick_l1_tiles(La, Lb, Dp, l1_bytes, temp_budget_bytes=2 * 1024 * 1024):
    """Chunk sizes for the (La, lb_chunk, d_chunk) L1 broadcast temp."""
    d_chunk = min(128, Dp)
    per_col = max(La * d_chunk * l1_bytes, 1)
    max_lbc = max(8, temp_budget_bytes // per_col)
    if max_lbc >= Lb:
        lb_chunk = Lb
    else:
        lb_chunk = max(8, (max_lbc // 8) * 8)
    return d_chunk, int(lb_chunk)


def _pick_batch_tile(B, est_fn, budget_bytes, min_grid):
    """Largest divisor of B fitting the step budget, with grid >= min_grid."""
    best = 1
    for bt in range(1, B + 1):
        if B % bt:
            continue
        if B // bt < min_grid:
            continue
        if est_fn(bt) <= budget_bytes:
            best = max(best, bt)
    return best


# ------------------------------- kernel -------------------------------------


def _make_ife_kernel(batch_tile, d_chunk, lb_chunk, matmul_dtype, l1_dtype,
                     approx_recip):
    """batch_tile / chunk sizes / dtypes / recip mode are compile-time."""

    def softmax_rows(x):
        m = jnp.max(x, axis=-1, keepdims=True)
        e = jnp.exp(x - m)
        s = jnp.sum(e, axis=-1, keepdims=True)
        if approx_recip:
            return e * pl.reciprocal(s, approx=True)
        return e / s

    def kernel(alpha_ref, beta_ref, a_ref, b_ref, ma_ref, mb_ref,
               amac_ref, bmac_ref):
        alpha = alpha_ref[0]          # SMEM scalar (hoisted out of batch loop)
        neg_beta = -beta_ref[0]

        La = a_ref.shape[1]
        Lb = b_ref.shape[1]
        Dp = a_ref.shape[2]

        def body(i, carry):
            # One batch element live at a time (fori_loop bounds live ranges).
            a_i = a_ref[i]                         # (La, Dp)  input dtype
            b_i = b_ref[i]                         # (Lb, Dp)
            ma_i = ma_ref[i]                       # (La, 1)   f32 0/1
            mb_i = mb_ref[i]                       # (1, Lb)   f32 0/1

            a_mm = a_i.astype(matmul_dtype)
            b_mm = b_i.astype(matmul_dtype)

            # normal_attn scores (raw, unmasked) on the MXU, f32 accumulation.
            scores = jax.lax.dot_general(
                a_mm, b_mm, (((1,), (1,)), ((), ())),
                preferred_element_type=jnp.float32) * alpha        # (La, Lb)

            # cdist(a, b, p=1): chunked over Lb and the feature dim so the
            # broadcast temp is only (La, lb_chunk, d_chunk).  Elementwise
            # abs-diff runs in l1_dtype (bf16 on v6e/v7x); the lane reduction
            # accumulates in f32.
            a_l1 = a_i.astype(l1_dtype)
            b_l1 = b_i.astype(l1_dtype)
            cols = []
            for j0 in range(0, Lb, lb_chunk):
                j1 = min(j0 + lb_chunk, Lb)
                bj = b_l1[j0:j1]                                   # (Lbc, Dp)
                acc = jnp.zeros((La, j1 - j0), jnp.float32)
                for d0 in range(0, Dp, d_chunk):
                    d1 = min(d0 + d_chunk, Dp)
                    diff = jnp.abs(a_l1[:, None, d0:d1]
                                   - bj[None, :, d0:d1])           # (La,Lbc,Dc)
                    acc = acc + jnp.sum(diff, axis=-1, dtype=jnp.float32)
                cols.append(acc)
            l1 = cols[0] if len(cols) == 1 else jnp.concatenate(cols, axis=1)

            # attn = normal * sigmoid(-beta * l1); masked pairs -> exactly 0
            # (reference: (-1e7) * sigmoid(-1e7) == 0).  A select (not a 0/1
            # multiply) keeps this robust even if padded embeddings are
            # non-finite.  Masked entries still participate in the softmax
            # with value 0, matching the reference semantics.
            attn = scores * jax.nn.sigmoid(l1 * neg_beta)          # (La, Lb)
            pair = jnp.logical_and(ma_i > 0.5, mb_i > 0.5)         # (La, Lb)
            attn = jnp.where(pair, attn, 0.0)

            # a_mac = softmax(attn, dim=2) @ b
            p_row = softmax_rows(attn).astype(matmul_dtype)
            amac_ref[i] = jnp.dot(
                p_row, b_mm,
                preferred_element_type=jnp.float32).astype(amac_ref.dtype)

            # b_mac = softmax(attn, dim=1)^T @ a : transpose attn once, reuse
            # the row-softmax (lane-reduction) path, then a plain matmul.
            p_col = softmax_rows(attn.T).astype(matmul_dtype)      # (Lb, La)
            bmac_ref[i] = jnp.dot(
                p_col, a_mm,
                preferred_element_type=jnp.float32).astype(bmac_ref.dtype)
            return carry

        jax.lax.fori_loop(0, batch_tile, body, 0)

    return kernel


# ------------------------------- wrapper ------------------------------------


def ife_forward(a, b, mask_a, mask_b, alpha, beta, *,
                matmul_dtype=jnp.bfloat16,
                l1_dtype=None,
                approx_recip=None,
                min_grid_steps=2,
                vmem_limit_bytes=None,
                vmem_step_budget_bytes=None):
    """Pallas implementation of IFE.forward.

    a: (B, La, D) f32, b: (B, Lb, D) f32, mask_a: (B, La, 1), mask_b: (B, Lb, 1)
    (0/1 padding masks).  Returns (a_mac, b_mac): (B, La, D), (B, Lb, D) f32.
    """
    B, La, D = a.shape
    Lb = b.shape[1]

    matmul_dtype = jnp.dtype(matmul_dtype)
    if l1_dtype is None:
        l1_dtype = (jnp.float32 if matmul_dtype == jnp.dtype(jnp.float32)
                    else _default_l1_dtype())
    l1_dtype = jnp.dtype(l1_dtype)
    if approx_recip is None:
        approx_recip = matmul_dtype != jnp.dtype(jnp.float32)

    plan_limit, plan_budget = _vmem_plan()
    if vmem_limit_bytes is None:
        vmem_limit_bytes = plan_limit
    if vmem_step_budget_bytes is None:
        vmem_step_budget_bytes = plan_budget

    # bf16 MXU config -> feed inputs in bf16 (halves DMA bytes + input tiles).
    in_dtype = (jnp.dtype(jnp.bfloat16)
                if matmul_dtype == jnp.dtype(jnp.bfloat16)
                else jnp.dtype(jnp.float32))
    a = a.astype(in_dtype)
    b = b.astype(in_dtype)

    # Lane-dense feature dim: zero-pad D to a multiple of 128 (no effect on
    # a @ b^T or the L1 distance).  La/Lb are NOT padded: extra zero rows/cols
    # would change the softmax denominators.
    Dp = ((D + 127) // 128) * 128
    if Dp != D:
        a = jnp.pad(a, ((0, 0), (0, 0), (0, Dp - D)))
        b = jnp.pad(b, ((0, 0), (0, 0), (0, Dp - D)))

    mask_a = mask_a.astype(jnp.float32).reshape(B, La, 1)
    mask_bt = mask_b.astype(jnp.float32).reshape(B, 1, Lb)   # pre-transposed
    alpha_arr = jnp.asarray([alpha], dtype=jnp.float32)
    beta_arr = jnp.asarray([beta], dtype=jnp.float32)

    in_b = in_dtype.itemsize
    mm_b = matmul_dtype.itemsize
    l1_b = l1_dtype.itemsize
    d_chunk, lb_chunk = _pick_l1_tiles(La, Lb, Dp, l1_b)

    def est(bt):
        f32 = 4
        io = 2 * bt * (La + Lb) * Dp * (in_b + f32)     # dbl-buffered in/out tiles
        masks = 2 * bt * (La + Lb) * f32
        temps = (6 * La * Lb * f32                      # attn / softmax / l1 temps
                 + La * lb_chunk * d_chunk * l1_b       # L1 broadcast chunk
                 + (La + Lb) * Dp * (mm_b + l1_b))      # operand casts (1 element)
        return io + masks + temps

    bt = _pick_batch_tile(B, est, vmem_step_budget_bytes,
                          min(B, max(1, min_grid_steps)))
    grid = (B // bt,)

    kernel = _make_ife_kernel(bt, d_chunk, lb_chunk, matmul_dtype, l1_dtype,
                              approx_recip)
    smem = pl.BlockSpec(memory_space=pltpu.MemorySpace.SMEM)

    a_mac, b_mac = pl.pallas_call(
        kernel,
        out_shape=(jax.ShapeDtypeStruct((B, La, Dp), jnp.float32),
                   jax.ShapeDtypeStruct((B, Lb, Dp), jnp.float32)),
        grid=grid,
        in_specs=[
            smem,                                                   # alpha
            smem,                                                   # beta
            pl.BlockSpec((bt, La, Dp), lambda i: (i, 0, 0)),        # a
            pl.BlockSpec((bt, Lb, Dp), lambda i: (i, 0, 0)),        # b
            pl.BlockSpec((bt, La, 1), lambda i: (i, 0, 0)),         # mask_a
            pl.BlockSpec((bt, 1, Lb), lambda i: (i, 0, 0)),         # mask_b^T
        ],
        out_specs=(pl.BlockSpec((bt, La, Dp), lambda i: (i, 0, 0)),
                   pl.BlockSpec((bt, Lb, Dp), lambda i: (i, 0, 0))),
        compiler_params=pltpu.CompilerParams(
            dimension_semantics=("parallel",),
            vmem_limit_bytes=int(vmem_limit_bytes)),
    )(alpha_arr, beta_arr, a, b, mask_a, mask_bt)

    if Dp != D:
        a_mac = a_mac[..., :D]
        b_mac = b_mac[..., :D]
    return a_mac, b_mac


# ------------------------------- reference ----------------------------------


def ife_reference(a, b, mask_a, mask_b, alpha, beta):
    """Pure-JAX reference mirroring the PyTorch module exactly."""
    mask = jnp.matmul(mask_a.astype(jnp.float32),
                      jnp.transpose(mask_b.astype(jnp.float32), (0, 2, 1))) > 0
    normal = jnp.matmul(a, jnp.transpose(b, (0, 2, 1))) * alpha
    normal = jnp.where(mask, normal, -10000000.0)
    l1 = jnp.sum(jnp.abs(a[:, :, None, :] - b[:, None, :, :]), axis=-1)
    diff = jnp.where(mask, l1 * (-beta), -10000000.0)
    diff = jax.nn.sigmoid(diff)
    attn = normal * diff
    a_mac = jnp.matmul(jax.nn.softmax(attn, axis=2), b)
    b_mac = jnp.matmul(jnp.transpose(jax.nn.softmax(attn, axis=1), (0, 2, 1)), a)
    return a_mac, b_mac


if __name__ == "__main__":
    B, La, Lb, D = 2, 8, 16, 32
    key = jax.random.PRNGKey(0)
    k1, k2 = jax.random.split(key)
    a = jax.random.normal(k1, (B, La, D), dtype=jnp.float32)
    b = jax.random.normal(k2, (B, Lb, D), dtype=jnp.float32)

    # 0/1 padding masks (second batch element has trailing padding).
    mask_a = (jnp.arange(La)[None, :, None]
              < jnp.array([La, La - 2])[:, None, None]).astype(jnp.float32)
    mask_b = (jnp.arange(Lb)[None, :, None]
              < jnp.array([Lb, Lb - 3])[:, None, None]).astype(jnp.float32)

    # nn.Parameter init: alpha = beta = 1 / sqrt(input_size)
    alpha = 1.0 / math.sqrt(D)
    beta = 1.0 / math.sqrt(D)

    ra, rb = ife_reference(a, b, mask_a, mask_b, alpha, beta)

    # 1) exact-semantics config (f32 matmuls, f32 L1, exact division).
    a32, b32 = ife_forward(a, b, mask_a, mask_b, alpha, beta,
                           matmul_dtype=jnp.float32)
    jax.block_until_ready((a32, b32))
    assert a32.shape == (B, La, D) and b32.shape == (B, Lb, D)
    assert jnp.allclose(a32, ra, atol=5e-3, rtol=5e-3)
    assert jnp.allclose(b32, rb, atol=5e-3, rtol=5e-3)

    # 2) perf config (bf16 inputs + MXU operands, f32 accumulation,
    #    bf16 elementwise L1 on v6e/v7x) -> looser numerics.
    abf, bbf = ife_forward(a, b, mask_a, mask_b, alpha, beta,
                           matmul_dtype=jnp.bfloat16)
    jax.block_until_ready((abf, bbf))
    assert abf.shape == (B, La, D) and bbf.shape == (B, Lb, D)
    assert jnp.allclose(abf, ra, atol=1e-1, rtol=1e-1)
    assert jnp.allclose(bbf, rb, atol=1e-1, rtol=1e-1)

    print("KERNEL_OK")
</pallas_src>

<mosaic_0001>
module attributes {stable_mosaic.version = 11 : i64} {
  func.func @kernel(%arg0: i32, %arg1: memref<1xf32, #tpu.memory_space<smem>>, %arg2: memref<1xf32, #tpu.memory_space<smem>>, %arg3: memref<1x8x128xf32, #tpu.memory_space<vmem>>, %arg4: memref<1x16x128xf32, #tpu.memory_space<vmem>>, %arg5: memref<1x8x1xf32, #tpu.memory_space<vmem>>, %arg6: memref<1x1x16xf32, #tpu.memory_space<vmem>>, %arg7: memref<1x8x128xf32, #tpu.memory_space<vmem>>, %arg8: memref<1x16x128xf32, #tpu.memory_space<vmem>>) attributes {dimension_semantics = [#tpu.dimension_semantics<parallel>], iteration_bounds = array<i64: 2>, scalar_prefetch = 0 : i64, scratch_operands = 0 : i64, tpu.core_type = #tpu.core_type<tc>, window_params = [{transform_indices = @transform_0, window_bounds = array<i64: 1>}, {transform_indices = @transform_1, window_bounds = array<i64: 1>}, {transform_indices = @transform_2, window_bounds = array<i64: 1, 8, 128>}, {transform_indices = @transform_3, window_bounds = array<i64: 1, 16, 128>}, {transform_indices = @transform_4, window_bounds = array<i64: 1, 8, 1>}, {transform_indices = @transform_5, window_bounds = array<i64: 1, 1, 16>}, {transform_indices = @transform_6, window_bounds = array<i64: 1, 8, 128>}, {transform_indices = @transform_7, window_bounds = array<i64: 1, 16, 128>}]} {
    %c0 = arith.constant 0 : index
    %0 = memref.load %arg1[%c0] : memref<1xf32, #tpu.memory_space<smem>>
    %c0_0 = arith.constant 0 : index
    %1 = memref.load %arg2[%c0_0] : memref<1xf32, #tpu.memory_space<smem>>
    %cst = arith.constant 0.000000e+00 : f32
    %2 = arith.subf %cst, %1 : f32
    %c0_i32 = arith.constant 0 : i32
    %3 = arith.index_cast %c0_i32 : i32 to index
    %c0_1 = arith.constant 0 : index
    %c0_2 = arith.constant 0 : index
    %4 = vector.load %arg3[%3, %c0_1, %c0_2] : memref<1x8x128xf32, #tpu.memory_space<vmem>>, vector<1x8x128xf32>
    %5 = vector.shape_cast %4 : vector<1x8x128xf32> to vector<8x128xf32>
    %6 = arith.index_cast %c0_i32 : i32 to index
    %c0_3 = arith.constant 0 : index
    %c0_4 = arith.constant 0 : index
    %7 = vector.load %arg4[%6, %c0_3, %c0_4] : memref<1x16x128xf32, #tpu.memory_space<vmem>>, vector<1x16x128xf32>
    %8 = vector.shape_cast %7 : vector<1x16x128xf32> to vector<16x128xf32>
    %9 = arith.index_cast %c0_i32 : i32 to index
    %c0_5 = arith.constant 0 : index
    %c0_6 = arith.constant 0 : index
    %10 = vector.load %arg5[%9, %c0_5, %c0_6] : memref<1x8x1xf32, #tpu.memory_space<vmem>>, vector<1x8x1xf32>
    %11 = vector.shape_cast %10 : vector<1x8x1xf32> to vector<8x1xf32>
    %12 = arith.index_cast %c0_i32 : i32 to index
    %c0_7 = arith.constant 0 : index
    %c0_8 = arith.constant 0 : index
    %13 = vector.load %arg6[%12, %c0_7, %c0_8] : memref<1x1x16xf32, #tpu.memory_space<vmem>>, vector<1x1x16xf32>
    %14 = vector.shape_cast %13 : vector<1x1x16xf32> to vector<1x16xf32>
    %cst_9 = arith.constant dense<0.000000e+00> : vector<8x16xf32>
    %15 = tpu.matmul %5, %8, %cst_9 {dimension_numbers = #tpu.dot_dimension_numbers<[1], [1], [0], [0], [0, 0, 1, 0], [], []>} : vector<8x128xf32>, vector<16x128xf32>, vector<8x16xf32> -> vector<8x16xf32>
    %16 = vector.broadcast %0 : f32 to vector<8x16xf32>
    %17 = arith.mulf %15, %16 : vector<8x16xf32>
    %cst_10 = arith.constant 0.000000e+00 : f32
    %18 = vector.broadcast %cst_10 : f32 to vector<8x16xf32>
    %19 = vector.shape_cast %5 : vector<8x128xf32> to vector<8x1x128xf32>
    %20 = vector.shape_cast %8 : vector<16x128xf32> to vector<1x16x128xf32>
    %21 = vector.broadcast %19 : vector<8x1x128xf32> to vector<8x16x128xf32>
    %22 = vector.broadcast %20 : vector<1x16x128xf32> to vector<8x16x128xf32>
    %23 = arith.subf %21, %22 : vector<8x16x128xf32>
    %24 = math.absf %23 : vector<8x16x128xf32>
    %cst_11 = arith.constant dense<0.000000e+00> : vector<8x16xf32>
    %25 = vector.multi_reduction <add>, %24, %cst_11 [2] : vector<8x16x128xf32> to vector<8x16xf32>
    %26 = arith.addf %18, %25 : vector<8x16xf32>
    %27 = vector.broadcast %2 : f32 to vector<8x16xf32>
    %28 = arith.mulf %26, %27 : vector<8x16xf32>
    %29 = arith.negf %28 : vector<8x16xf32>
    %30 = math.exp %29 : vector<8x16xf32>
    %cst_12 = arith.constant 1.000000e+00 : f32
    %31 = vector.broadcast %cst_12 : f32 to vector<8x16xf32>
    %32 = arith.addf %31, %30 : vector<8x16xf32>
    %33 = arith.divf %31, %32 : vector<8x16xf32>
    %34 = arith.mulf %17, %33 : vector<8x16xf32>
    %cst_13 = arith.constant 5.000000e-01 : f32
    %35 = vector.broadcast %cst_13 : f32 to vector<8x1xf32>
    %36 = arith.cmpf ogt, %11, %35 : vector<8x1xf32>
    %cst_14 = arith.constant 5.000000e-01 : f32
    %37 = vector.broadcast %cst_14 : f32 to vector<1x16xf32>
    %38 = arith.cmpf ogt, %14, %37 : vector<1x16xf32>
    %39 = vector.broadcast %36 : vector<8x1xi1> to vector<8x16xi1>
    %40 = vector.broadcast %38 : vector<1x16xi1> to vector<8x16xi1>
    %41 = arith.andi %39, %40 : vector<8x16xi1>
    %cst_15 = arith.constant 0.000000e+00 : f32
    %42 = vector.broadcast %cst_15 : f32 to vector<8x16xf32>
    %43 = arith.select %41, %34, %42 : vector<8x16xi1>, vector<8x16xf32>
    %cst_16 = arith.constant dense<0xFF800000> : vector<8xf32>
    %44 = vector.multi_reduction <maximumf>, %43, %cst_16 [1] : vector<8x16xf32> to vector<8xf32>
    %45 = vector.shape_cast %44 : vector<8xf32> to vector<8x1xf32>
    %46 = vector.broadcast %45 : vector<8x1xf32> to vector<8x16xf32>
    %47 = arith.subf %43, %46 : vector<8x16xf32>
    %48 = math.exp %47 : vector<8x16xf32>
    %cst_17 = arith.constant dense<0.000000e+00> : vector<8xf32>
    %49 = vector.multi_reduction <add>, %48, %cst_17 [1] : vector<8x16xf32> to vector<8xf32>
    %50 = vector.shape_cast %49 : vector<8xf32> to vector<8x1xf32>
    %51 = vector.broadcast %50 : vector<8x1xf32> to vector<8x16xf32>
    %52 = arith.divf %48, %51 : vector<8x16xf32>
    %cst_18 = arith.constant dense<0.000000e+00> : vector<8x128xf32>
    %53 = tpu.matmul %52, %8, %cst_18 {dimension_numbers = #tpu.dot_dimension_numbers<[1], [0], [0], [1], [0, 0, 1, 1], [], []>} : vector<8x16xf32>, vector<16x128xf32>, vector<8x128xf32> -> vector<8x128xf32>
    %54 = arith.index_cast %c0_i32 : i32 to index
    %c0_19 = arith.constant 0 : index
    %c0_20 = arith.constant 0 : index
    %55 = vector.load %arg7[%54, %c0_19, %c0_20] : memref<1x8x128xf32, #tpu.memory_space<vmem>>, vector<1x8x128xf32>
    %56 = vector.shape_cast %55 : vector<1x8x128xf32> to vector<8x128xf32>
    %57 = vector.shape_cast %53 : vector<8x128xf32> to vector<1x8x128xf32>
    tpu.vector_store %arg7[%54, %c0_19, %c0_20], %57 {strides = array<i32>} : memref<1x8x128xf32, #tpu.memory_space<vmem>>, vector<1x8x128xf32>,
    %58 = tpu.transpose %43, [1, 0] : vector<8x16xf32> -> vector<16x8xf32>
    %cst_21 = arith.constant dense<0xFF800000> : vector<16xf32>
    %59 = vector.multi_reduction <maximumf>, %58, %cst_21 [1] : vector<16x8xf32> to vector<16xf32>
    %60 = vector.shape_cast %59 : vector<16xf32> to vector<16x1xf32>
    %61 = vector.broadcast %60 : vector<16x1xf32> to vector<16x8xf32>
    %62 = arith.subf %58, %61 : vector<16x8xf32>
    %63 = math.exp %62 : vector<16x8xf32>
    %cst_22 = arith.constant dense<0.000000e+00> : vector<16xf32>
    %64 = vector.multi_reduction <add>, %63, %cst_22 [1] : vector<16x8xf32> to vector<16xf32>
    %65 = vector.shape_cast %64 : vector<16xf32> to vector<16x1xf32>
    %66 = vector.broadcast %65 : vector<16x1xf32> to vector<16x8xf32>
    %67 = arith.divf %63, %66 : vector<16x8xf32>
    %cst_23 = arith.constant dense<0.000000e+00> : vector<16x128xf32>
    %68 = tpu.matmul %67, %5, %cst_23 {dimension_numbers = #tpu.dot_dimension_numbers<[1], [0], [0], [1], [0, 0, 1, 1], [], []>} : vector<16x8xf32>, vector<8x128xf32>, vector<16x128xf32> -> vector<16x128xf32>
    %69 = arith.index_cast %c0_i32 : i32 to index
    %c0_24 = arith.constant 0 : index
    %c0_25 = arith.constant 0 : index
    %70 = vector.load %arg8[%69, %c0_24, %c0_25] : memref<1x16x128xf32, #tpu.memory_space<vmem>>, vector<1x16x128xf32>
    %71 = vector.shape_cast %70 : vector<1x16x128xf32> to vector<16x128xf32>
    %72 = vector.shape_cast %68 : vector<16x128xf32> to vector<1x16x128xf32>
    tpu.vector_store %arg8[%69, %c0_24, %c0_25], %72 {strides = array<i32>} : memref<1x16x128xf32, #tpu.memory_space<vmem>>, vector<1x16x128xf32>,
    %c1_i32 = arith.constant 1 : i32
    return
  }
  func.func @transform_0(%arg0: i32) -> i32 {
    %c0_i32 = arith.constant 0 : i32
    %c0_i32_0 = arith.constant 0 : i32
    return %c0_i32 : i32
  }
  func.func @transform_1(%arg0: i32) -> i32 {
    %c0_i32 = arith.constant 0 : i32
    %c0_i32_0 = arith.constant 0 : i32
    return %c0_i32 : i32
  }
  func.func @transform_2(%arg0: i32) -> (i32, i32, i32) {
    %c0_i32 = arith.constant 0 : i32
    %c0_i32_0 = arith.constant 0 : i32
    %c0_i32_1 = arith.constant 0 : i32
    return %arg0, %c0_i32, %c0_i32_0 : i32, i32, i32
  }
  func.func @transform_3(%arg0: i32) -> (i32, i32, i32) {
    %c0_i32 = arith.constant 0 : i32
    %c0_i32_0 = arith.constant 0 : i32
    %c0_i32_1 = arith.constant 0 : i32
    return %arg0, %c0_i32, %c0_i32_0 : i32, i32, i32
  }
  func.func @transform_4(%arg0: i32) -> (i32, i32, i32) {
    %c0_i32 = arith.constant 0 : i32
    %c0_i32_0 = arith.constant 0 : i32
    %c0_i32_1 = arith.constant 0 : i32
    return %arg0, %c0_i32, %c0_i32_0 : i32, i32, i32
  }
  func.func @transform_5(%arg0: i32) -> (i32, i32, i32) {
    %c0_i32 = arith.constant 0 : i32
    %c0_i32_0 = arith.constant 0 : i32
    %c0_i32_1 = arith.constant 0 : i32
    return %arg0, %c0_i32, %c0_i32_0 : i32, i32, i32
  }
  func.func @transform_6(%arg0: i32) -> (i32, i32, i32) {
    %c0_i32 = arith.constant 0 : i32
    %c0_i32_0 = arith.constant 0 : i32
    %c0_i32_1 = arith.constant 0 : i32
    return %arg0, %c0_i32, %c0_i32_0 : i32, i32, i32
  }
  func.func @transform_7(%arg0: i32) -> (i32, i32, i32) {
    %c0_i32 = arith.constant 0 : i32
    %c0_i32_0 = arith.constant 0 : i32
    %c0_i32_1 = arith.constant 0 : i32
    return %arg0, %c0_i32, %c0_i32_0 : i32, i32, i32
  }
}

</mosaic_0001>

<bundles_post_ra>
// kernel: tpu_custom_call.1
= control target key start
LH: loop header
LB: loop body
LE: loop exit
PB: predicated region body
PF: predicated region fallthrough
CT: control target
= control target key end

     0   :  { %s2246_s0 = inlined_call_operand.<no memory space> [shape: f32[1], index: 0, kind: input, shape index: {}]   ;;  %s2247_s1 = inlined_call_operand.<no memory space> [shape: f32[1], index: 1, kind: input, shape index: {}]   ;;  %s2248_s2 = inlined_call_operand.hbm [shape: f32[2,8,128], index: 2, kind: input, shape index: {}]   ;;  %s2249_s3 = inlined_call_operand.hbm [shape: f32[2,16,128], index: 3, kind: input, shape index: {}]   ;;  %s2250_s4 = inlined_call_operand.hbm [shape: f32[2,8,1], index: 4, kind: input, shape index: {}]   ;;  %s2251_s5 = inlined_call_operand.hbm [shape: f32[2,1,16], index: 5, kind: input, shape index: {}]   ;;  %s2252_s6 = inlined_call_operand.hbm [shape: f32[2,8,128], index: 6, kind: output, shape index: {0}]   ;;  %s2253_s7 = inlined_call_operand.hbm [shape: f32[2,16,128], index: 7, kind: output, shape index: {1}]  }
   0x1   :  { %2260 = sst [smem:[#allocation21_spill]] %s2249_s3 }
   0x2   :  { %13 = sst [smem:[#allocation2]] %s2246_s0 }
   0x3   :  { %14 = sst [smem:[#allocation3]] %s2247_s1 }
   0x4   :  { %15 = vsyncpa [#allocation5], 0 }
   0x5   :  { %17 = vsyncpa [#allocation5 + $0x1], 0 }
   0x6   :  { %18 = vsyncpa [#allocation8], 0 }
   0x7   :  { %20 = vsyncpa [#allocation8 + $0x1], 0 }
   0x8   :  { %21 = vsyncpa [#allocation11], 0 }
   0x9   :  { %23 = vsyncpa [#allocation11 + $0x1], 0 }
   0xa   :  { %24 = vsyncpa [#allocation6], 0 }
   0xb   :  { %26 = vsyncpa [#allocation6 + $0x1], 0 }
   0xc   :  { %27 = vsyncpa [#allocation14], 0 }
   0xd   :  { %29 = vsyncpa [#allocation14 + $0x1], 0  ;;  %s1846_s28 = smov 0   ;;  %s1848_s29 = smov 0  }
   0xe   :  { %s1850_s30 = smov 0   ;;  %s1852_s0 = smov 0  }
   0xf LB: > { %s1867_s1 = sadd.s32 4294967295, %s1783_s0   ;;  %s1325_s8 = sadd.s32 4294967294, %s1783_s0   ;;  %s1783_s0 = sphi %s1852_s0, %s2284_s0   ;;  %s1779_s30 = sphi %s1850_s30, %s2283_s30   ;;  %s1775_s29 = sphi %s1848_s29, %s2282_s29   ;;  %s1771_s28 = sphi %s1846_s28, %s2281_s28  }
  0x10   : > { %s1871_s9 = sadd.s32 1, %s1783_s0   ;;  %s84_s10 = sadd.s32 1, %s1779_s30 }
  0x11   : > { %s81_s11 = ssub.s32 %s1783_s0, %s1871_s9  ;;  %p91_p0 = scmp.ne.s32.totalorder %s1779_s30, %s1775_s29 }
  0x12   : > { %p82_p1 = scmp.eq.s32.totalorder %s81_s11, 0  ;;  %p92_p2 = scmp.eq.s32.totalorder %s1783_s0, 0 }
  0x13   : > { %p97_p3 = scmp.ne.s32.totalorder %s1775_s29, %s1771_s28  ;;  %p98_p4 = scmp.eq.s32.totalorder %s1867_s1, 0 }
  0x14   : > { %s1883_s12 = scalar_select %p82_p1, %s1779_s30, %s84_s10  }
  0x15   : > { %p93_p5 = por %p92_p2, %p91_p0  ;;  %p1885_p6 = por %p98_p4, %p97_p3 }
  0x16   : > { %2261 = sst [smem:[#allocation20_spill]] %s1883_s12  ;;  %p199_p7 = scmp.eq.s32.totalorder %s1867_s1, 1 }
  0x17   : > { %s2262_s13 = scalar_select %p1885_p6, 1, 0 }
  0x18   : > { %p205_p8 = scmp.eq.s32.totalorder %s1325_s8, 1  ;;  %p1436_p10 = scmp.lt.s32.totalorder %s1783_s0, 2 }
  0x19   : > { %p1892_p11 = por %p199_p7, %p91_p0  ;;  %s1901_s16 = sand.u32 1, %s1779_s30  }
  0x1a   : > { %p1896_p12 = por %p205_p8, %p97_p3  ;;  %p1903_p13 = pnand %p1436_p10, %p93_p5 }
  0x1b   : > { %s2263_s14 = scalar_select %p1892_p11, 1, 0 }
  0x1c   : > { %s2264_s15 = scalar_select %p1896_p12, 1, 0 }
  0x1d   : > { %s2265_s17 = scalar_select %p1903_p13, 1, 0 }
  0x1e   : > { %s275_s18 = sand.u32 1, %s1783_s0   ;;  %s1330_s19 = sshll.u32 %s1901_s16, 4 }
  0x1f   : > { %s1368_s20 = sshll.u32 %s1783_s0, 8  ;;  %s2266_s3 = sld [smem:[#allocation21_spill]] }
  0x20   : > { %s279_s24 = scalar_lea.vmem [#allocation7], %s1330_s19  ;;  %s1918_s26 = scalar_lea.sflag [#allocation8], %s275_s18 }
  0x21   : > { %s286_s25 = sshll.u32 %s279_s24, 4  ;;  %p1924_p2 = pneg %p1903_p13  ;;  %s1915_s25 = int_to_ptr.vmem [resolvable:$true] %s286_s25 }
  0x25   : > { %s1913_s23 = scalar_lea.hbm %s2266_s3, %s1368_s20  ;;  %s1562_s19 = scalar_lea.hbm %s2266_s3, 512 }
  0x26   : > { %s1557_s27 = scalar_lea.hbm %s1913_s23, 256  ;;  %p1563_p5 = scmp.lt.u32.totalorder %s1913_s23, %s2266_s3 }
  0x27   : > { %p1558_p1 = scmp.ne.s32.totalorder %s1913_s23, %s1557_s27  ;;  %p1564_p7 = scmp.lt.u32.totalorder %s1562_s19, %s1557_s27 }
  0x28   : > { %p1566_p10 = scmp.lt.u32.totalorder %s1557_s27, %s1913_s23 }
  0x29   : > { %p1560_p3 = pnand %p1924_p2, %p1558_p1  ;;  %p1565_p8 = por %p1564_p7, %p1563_p5 }
  0x2b   : > { %p1561_p4 = pneg %p1560_p3  ;;  %p1567_p9 = por %p1566_p10, %p1565_p8 }
  0x2d   : > { %p1568_p0 = pnand %p1567_p9, %p1561_p4 }
  0x2f   : > { %1571 = shalt.err (!%p1568_p0)
}
  0x30   : > { %s1572_s18 = scalar_lea.vmem %s1915_s25, 256  ;;  %s1785_s22 = smov [#allocation7]  }
  0x31   : > { %p1573_p1 = scmp.ne.s32.totalorder %s1915_s25, %s1572_s18  ;;  %s1577_s24 = sshll.u32 %s1785_s22, 4  ;;  %s1578_s24 = int_to_ptr.vmem [resolvable:$false] %s1577_s24 }
  0x32   : > { %s1579_s10 = scalar_lea.vmem %s1578_s24, 512  ;;  %p1580_p11 = scmp.lt.s32.totalorder %s1915_s25, %s1578_s24 }
  0x33   : > { %p1575_p3 = pnand %p1573_p1, %p1924_p2  ;;  %p1581_p6 = scmp.lt.s32.totalorder %s1579_s10, %s1572_s18 }
  0x35   : > { %p1576_p12 = pneg %p1575_p3  ;;  %p1582_p5 = por %p1581_p6, %p1580_p11 }
  0x37   : > { %p1583_p7 = pnand %p1582_p5, %p1576_p12 }
  0x39   : > { %1586 = shalt.err (!%p1583_p7)
}
  0x3a   : > { %s1786_s27 = smov 128   ;;  %s1787_s11 = smov 8  }
  0x3b   : > { %1422 = dma.hbm_to_vmem [thread:$0]  (!%p1903_p13), %s1913_s23, 256, %s1915_s25, %s1918_s26, %s1786_s27, %s1786_s27, %s1787_s11  }
  0x3c   : > { %p329_p9 = scmp.lt.s32.totalorder %s1783_s0, 3  ;;  %s2257_s19 = sshll.u32 %s1901_s16, 3 }
  0x3d   : > { %s2256_s20 = sshll.u32 %s1783_s0, 7  ;;  %p2268_p6 = scmp.ge.s32.totalorder %s1783_s0, 1 }
  0x3e   : > { %s1962_s24 = scalar_lea.hbm %s2248_s2, %s2256_s20  ;;  %s261_s23 = scalar_lea.vmem [#allocation4], %s2257_s19 }
  0x3f   : > { %p1953_p11 = pnand %p2268_p6, %p329_p9  ;;  %s268_s25 = sshll.u32 %s261_s23, 4  ;;  %s269_s25 = int_to_ptr.vmem [resolvable:$true] %s268_s25 }
  0x40   : > { %s258_s10 = scalar_lea.sflag [#allocation5], %s1901_s16  ;;  %s1587_s27 = scalar_lea.hbm %s1962_s24, 128 }
  0x41   : > { %s2269_s21 = scalar_select %p1953_p11, 1, 0 }
  0x42   : > { %p1588_p12 = scmp.ne.s32.totalorder %s1962_s24, %s1587_s27  ;;  %s1592_s18 = scalar_lea.hbm %s2248_s2, 256 }
  0x43   : > { %p1593_p8 = scmp.lt.u32.totalorder %s1962_s24, %s2248_s2  ;;  %p1594_p10 = scmp.lt.u32.totalorder %s1592_s18, %s1587_s27 }
  0x44   : > { %p1590_p0 = pnand %p1588_p12, %p1924_p2  ;;  %p1596_p3 = scmp.lt.u32.totalorder %s1587_s27, %s1962_s24 }
  0x45   : > { %p1595_p1 = por %p1594_p10, %p1593_p8 }
  0x46   : > { %p1591_p4 = pneg %p1590_p0 }
  0x47   : > { %p1597_p5 = por %p1596_p3, %p1595_p1 }
  0x49   : > { %p1598_p7 = pnand %p1597_p5, %p1591_p4 }
  0x4b   : > { %1601 = shalt.err (!%p1598_p7)
}
  0x4c   : > { %s1602_s23 = scalar_lea.vmem %s269_s25, 128  ;;  %s1788_s19 = smov [#allocation4]  }
  0x4d   : > { %p1603_p9 = scmp.ne.s32.totalorder %s269_s25, %s1602_s23  ;;  %s1607_s12 = sshll.u32 %s1788_s19, 4  ;;  %s1608_s12 = int_to_ptr.vmem [resolvable:$false] %s1607_s12 }
  0x4e   : > { %s1609_s3 = scalar_lea.vmem %s1608_s12, 256  ;;  %p1610_p0 = scmp.lt.s32.totalorder %s269_s25, %s1608_s12 }
  0x4f   : > { %p1605_p6 = pnand %p1603_p9, %p1924_p2  ;;  %p1611_p11 = scmp.lt.s32.totalorder %s1609_s3, %s1602_s23 }
  0x51   : > { %p1606_p12 = pneg %p1605_p6  ;;  %p1612_p13 = por %p1611_p11, %p1610_p0 }
  0x53   : > { %p1613_p8 = pnand %p1612_p13, %p1606_p12 }
  0x55   : > { %1616 = shalt.err (!%p1613_p8)
}
  0x56   : > { %p2270_p10 = scmp.ne.s32.totalorder %s2265_s17, 0  ;;  %s2271_s20 = sshll.u32 %s1783_s0, 7 }
  0x57   : > { %s1989_s18 = scalar_lea.hbm %s2250_s4, %s2271_s20  ;;  %s2272_s19 = sshll.u32 %s1901_s16, 3 }
  0x58   : > { %1419 = dma.hbm_to_vmem [thread:$0]  (!%p2270_p10), %s1962_s24, 128, %s269_s25, %s258_s10  }
  0x59   : > { %s300_s12 = scalar_lea.vmem [#allocation9], %s2272_s19  ;;  %s1617_s23 = scalar_lea.hbm %s1989_s18, 128 }
  0x5a   : > { %s307_s22 = sshll.u32 %s300_s12, 4  ;;  %p1618_p13 = scmp.ne.s32.totalorder %s1989_s18, %s1617_s23  ;;  %s308_s22 = int_to_ptr.vmem [resolvable:$true] %s307_s22 }
  0x5b   : > { %s1622_s10 = scalar_lea.hbm %s2250_s4, 256  ;;  %p1623_p1 = scmp.lt.u32.totalorder %s1989_s18, %s2250_s4 }
  0x5c   : > { %p1620_p11 = pnand %p1618_p13, %p1924_p2  ;;  %p1624_p3 = scmp.lt.u32.totalorder %s1622_s10, %s1617_s23 }
  0x5d   : > { %p1626_p7 = scmp.lt.u32.totalorder %s1617_s23, %s1989_s18 }
  0x5e   : > { %p1621_p4 = pneg %p1620_p11  ;;  %p1625_p5 = por %p1624_p3, %p1623_p1 }
  0x60   : > { %p1627_p9 = por %p1626_p7, %p1625_p5 }
  0x62   : > { %p1628_p6 = pnand %p1627_p9, %p1621_p4 }
  0x64   : > { %1631 = shalt.err (!%p1628_p6)
}
  0x65   : > { %s1632_s27 = scalar_lea.vmem %s308_s22, 128  ;;  %s1789_s11 = smov [#allocation9]  }
  0x66   : > { %p1633_p12 = scmp.ne.s32.totalorder %s308_s22, %s1632_s27  ;;  %s1637_s19 = sshll.u32 %s1789_s11, 4  ;;  %s1638_s19 = int_to_ptr.vmem [resolvable:$false] %s1637_s19 }
  0x67   : > { %s1639_s12 = scalar_lea.vmem %s1638_s19, 256  ;;  %p1640_p13 = scmp.lt.s32.totalorder %s308_s22, %s1638_s19 }
  0x68   : > { %p1635_p0 = pnand %p1633_p12, %p1924_p2  ;;  %p1641_p11 = scmp.lt.s32.totalorder %s1639_s12, %s1632_s27 }
  0x6a   : > { %p1636_p8 = pneg %p1635_p0  ;;  %p1642_p10 = por %p1641_p11, %p1640_p13 }
  0x6c   : > { %p1643_p1 = pnand %p1642_p10, %p1636_p8 }
  0x6e   : > { %1646 = shalt.err (!%p1643_p1)
}
  0x6f   : > { %p2273_p3 = scmp.ne.s32.totalorder %s2265_s17, 0  ;;  %s1335_s23 = sshll.u32 %s1783_s0, 4 }
  0x70   : > { %s2015_s10 = scalar_lea.hbm %s2251_s5, %s1335_s23  ;;  %s317_s3 = scalar_lea.vmem [#allocation10], %s1901_s16 }
  0x71   : > { %1425 = dma.hbm_to_vmem [thread:$0]  (!%p2273_p3), %s1989_s18, 128, %s308_s22, %s1918_s26  }
  0x72   : > { %s324_s20 = sshll.u32 %s317_s3, 4  ;;  %s315_s27 = scalar_lea.sflag [#allocation11], %s1901_s16  ;;  %s325_s20 = int_to_ptr.vmem [resolvable:$true] %s324_s20 }
  0x73   : > { %s1647_s11 = scalar_lea.hbm %s2015_s10, 16  ;;  %s1652_s22 = scalar_lea.hbm %s2251_s5, 32 }
  0x74   : > { %p1648_p10 = scmp.ne.s32.totalorder %s2015_s10, %s1647_s11  ;;  %p1653_p7 = scmp.lt.u32.totalorder %s2015_s10, %s2251_s5 }
  0x75   : > { %p1654_p9 = scmp.lt.u32.totalorder %s1652_s22, %s1647_s11  ;;  %p1656_p12 = scmp.lt.u32.totalorder %s1647_s11, %s2015_s10 }
  0x76   : > { %p1650_p4 = pnand %p1648_p10, %p1924_p2 }
  0x77   : > { %p1655_p6 = por %p1654_p9, %p1653_p7 }
  0x78   : > { %p1651_p5 = pneg %p1650_p4 }
  0x79   : > { %p1657_p0 = por %p1656_p12, %p1655_p6 }
  0x7b   : > { %p1658_p8 = pnand %p1657_p0, %p1651_p5 }
  0x7d   : > { %1661 = shalt.err (!%p1658_p8)
}
  0x7e   : > { %s1662_s16 = scalar_lea.vmem %s325_s20, 16  ;;  %s1790_s23 = smov [#allocation10]  }
  0x7f   : > { %p1663_p13 = scmp.ne.s32.totalorder %s325_s20, %s1662_s16  ;;  %s1667_s24 = sshll.u32 %s1790_s23, 4  ;;  %s1668_s24 = int_to_ptr.vmem [resolvable:$false] %s1667_s24 }
  0x80   : > { %s1669_s25 = scalar_lea.vmem %s1668_s24, 32  ;;  %p1670_p10 = scmp.lt.s32.totalorder %s325_s20, %s1668_s24 }
  0x81   : > { %p1665_p11 = pnand %p1663_p13, %p1924_p2  ;;  %p1671_p4 = scmp.lt.s32.totalorder %s1669_s25, %s1662_s16 }
  0x83   : > { %p1666_p1 = pneg %p1665_p11  ;;  %p1672_p3 = por %p1671_p4, %p1670_p10 }
  0x85   : > { %p1673_p7 = pnand %p1672_p3, %p1666_p1 }
  0x87   : > { %1676 = shalt.err (!%p1673_p7)
}
  0x88   : > { %p2274_p9 = scmp.ne.s32.totalorder %s2265_s17, 0  ;;  %p2275_p5 = scmp.ne.s32.totalorder %s2269_s21, 0 }
  0x89   : > { %s2039_s8 = sand.u32 (!%p2275_p5), 1, %s1775_s29   ;;  %p2276_p2 = scmp.ne.s32.totalorder (!%p2275_p5), %s2262_s13, 0 }
  0x8a   : > { %1428 = dma.hbm_to_vmem [thread:$0]  (!%p2274_p9), %s2015_s10, 16, %s325_s20, %s315_s27  }
  0x8b   : > { %333 = sbr.rel (%p2275_p5) target bundleno = 1056 (0x420), region = 44  ;;  %s2042_s3 = sshll.u32 (!%p2275_p5), %s2039_s8, 3 }
  0x8c   : > { %s336_s11 = scalar_lea.sflag (!%p2275_p5), [#allocation5], %s2039_s8  ;;  %s339_s26 = scalar_lea.vmem (!%p2275_p5), [#allocation4], %s2042_s3 }
  0x92   : > { %1750 = dma.done.wait (%p2276_p2), %s336_s11, 128  }
  0x93   : > { %1752 = vsyncadd (%p2276_p2), %s336_s11, 4294967168  ;;  %s344_s17 = sand.u32 1, %s1867_s1   ;;  %s1338_s21 = sshll.u32 %s2039_s8, 4 }
  0x94   : > { %s345_s10 = scalar_lea.sflag [#allocation8], %s344_s17  ;;  %s348_s20 = scalar_lea.vmem [#allocation7], %s1338_s21 }
  0x95   : > { %1754 = dma.done.wait (%p2276_p2), %s345_s10, 384  }
  0x96   : > { %1756 = vsyncadd (%p2276_p2), %s345_s10, 4294966912  ;;  %s357_s27 = scalar_lea.vmem [#allocation9], %s2042_s3  ;;  %s363_s18 = scalar_lea.sflag [#allocation11], %s2039_s8 }
  0x97   : > { %s365_s22 = scalar_lea.vmem [#allocation10], %s2039_s8 }
  0x98   : > { %1758 = dma.done.wait (%p2276_p2), %s363_s18, 16  }
  0x99   : > { %1760 = vsyncadd (%p2276_p2), %s363_s18, 4294967280  ;;  %v1791_v0 = vmov 0.0|0.0   ;;  %vm1792_vm0 = vmmov 0   ;;  %v1793_v1 = vmov 0.0   ;;  %v1794_v2 = vmov 1966171168  }
  0x9a   : > { %1398 = vmatprep.subr.bf16.mxu0 %v1791_v0  ;;  %1383 = vmatprep.mubr.msk.f32.mxu0 %vm1792_vm0, %v1793_v1  ;;  %v498_v3 = vunpack.c.l.s4 %v1794_v2  ;;  %v500_v4 = vlaneseq  ;;  %v1795_v5 = vmov 0   ;;  %v2068_v12 = vld [vmem:[%s348_s20] sm:$0xff]  ;;  %v2070_v13 = vld [vmem:[%s348_s20 + $0x8] sm:$0xff]  ;;  %s416_s13 = sld [smem:[#allocation3]]  ;;  %vm805_vm2 = vcmask 130112   ;;  %s407_s16 = scalar_lea.vmem [#allocation12], %s2042_s3 }
  0x9b   : > { %1479 = vset.pattern.permute.xlu0 %v1795_v5  ;;  %1401 = vmatprep.subr.bf16.mxu1 %v1791_v0  ;;  %v2074_v14 = vld [vmem:[%s339_s26] sm:$0xff]  ;;  %v1399_v16 = vpack.c.bf16 %v2070_v13, %v2068_v12  ;;  %vm870_vm3 = vcmask 1041409   ;;  %vm872_vm4 = vcmask 1042434   ;;  %vm874_vm5 = vcmask 1043459   ;;  %s415_s12 = sld [smem:[#allocation2]]  ;;  %s1144_s23 = sshll.u32 %s407_s16, 4  ;;  %s2171_s23 = int_to_ptr.vmem [resolvable:$true] %s1144_s23 }
  0x9c   : > { %v499_v6 = vunpack.c.0.s8 %v498_v3  ;;  %v501_v7 = vshrl.u32 %v500_v4, 7  ;;  %v795_v8 = vand.u32 127, %v500_v4  ;;  %1390 = vmatprep.mubr.msk.f32.mxu1 %vm1792_vm0, %v1793_v1  ;;  %v496_v19 = vcombine.high %v2074_v14, %v2074_v14  ;;  %s1363_s24 = sshll.u32 %s1867_s1, 7  ;;  %s1126_s17 = scalar_lea.sflag [#allocation6], %s2039_s8 }
  0x9d   : > { %1400 = vmatpush3.bf16.xpose.msra.mxu0 %v1399_v16  ;;  %1403 = vmatpush3.bf16.msra.mxu1 %v1399_v16  ;;  %vm876_vm6 = vcmask 1044484   ;;  %vm878_vm7 = vcmask 1045509   ;;  %vm880_vm8 = vcmask 1046534   ;;  %vm882_vm10 = vcmask 1047559   ;;  %s1142_s26 = scalar_lea.hbm %s2252_s6, %s1363_s24  ;;  %s1677_s10 = scalar_lea.vmem %s2171_s23, 128 }
  0x9e   : > { %v502_v9 = vsub.s32 %v499_v6, %v501_v7  ;;  %v2066_v10 = vsub.s32 %v795_v8, %v501_v7  ;;  %v800_v11 = vadd.s32 4294967288, %v795_v8  ;;  %v2081_v18 = vsub.s32 0, %v501_v7  ;;  %1393 = vmatprep.subr.mxu1 %v2074_v14  ;;  %v421_v8 = vld [vmem:[%s357_s27] sm:$0xff]  ;;  %p1678_p3 = scmp.ne.s32.totalorder %s2171_s23, %s1677_s10  ;;  %p2277_p6 = scmp.ne.s32.totalorder %s2263_s14, 0 }
  0x9f   : > { %vm886_vm1 = vcmp.gt.f32.partialorder %v421_v8, 0.5  ;;  %vm901_vm14 = vcmask 130048   ;;  %vm1019_vm15 = vcmask 64512   ;;  %s1796_s3 = smov [#allocation12]  }
  0xa0   : > { %v2076_v15 = vsub.s32 %v800_v11, %v501_v7  ;;  %v503_v17 = vrot.slane %v2074_v14, %v502_v9  ;;  %v510_v22 = vrot.slane %v496_v19, %v502_v9  ;;  %s417_s19 = ssub.f32 0.0, %s416_s13  ;;  %p1679_p12 = pnand %p1678_p3, %p2277_p6 }
  0xa1   : > { %s1681_s20 = sshll.u32 %s1796_s3, 4  ;;  %s1682_s20 = int_to_ptr.vmem [resolvable:$false] %s1681_s20 }
  0xa2   : > { %v519_v20 = vrot.slane %v503_v17, %v502_v9  ;;  %v511_v21 = vcombine.high %v503_v17, %v503_v17  ;;  %v526_v26 = vrot.slane %v510_v22, %v502_v9  ;;  %v512_v35 = vcombine.high %v510_v22, %v510_v22  ;;  %p1680_p0 = pneg %p1679_p12  ;;  %s1683_s27 = scalar_lea.vmem %s1682_s20, 256 }
  0xa3   : > { %v2114_v11 = vstv %s417_s19  ;;  %p1684_p8 = scmp.lt.s32.totalorder %s2171_s23, %s1682_s20  ;;  %p1685_p13 = scmp.lt.s32.totalorder %s1683_s27, %s1677_s10 }
  0xa4   : > { %v548_v23 = vrot.slane %v519_v20, %v2081_v18  ;;  %v533_v24 = vrot.slane %v511_v21, %v502_v9  ;;  %v541_v25 = vcombine.high %v519_v20, %v519_v20  ;;  %1384 = vmatmul.mubr.f32.vlgmr.msra.gmra.mrb[0].mxu0 %v2074_v14  ;;  %v564_v34 = vrot.slane %v526_v26, %v2081_v18 }
  0xa5   : > { %v540_v45 = vrot.slane %v512_v35, %v502_v9  ;;  %v542_v51 = vcombine.high %v526_v26, %v526_v26  ;;  %v888_v9 = vsel %vm886_vm1, 1, %v1795_v5  ;;  %p1686_p11 = por %p1685_p13, %p1684_p8 }
  0xa6   : > { %v585_v27 = vsub.f32 %v548_v23, %v2068_v12  ;;  %v552_v28 = vrot.slane %v533_v24, %v2081_v18  ;;  %v586_v29 = vsub.f32 %v548_v23, %v2070_v13  ;;  %v556_v30 = vrot.slane %v541_v25, %v2081_v18 }
  0xa7   : > { %v543_v39 = vcombine.high %v533_v24, %v533_v24  ;;  %v593_v43 = vsub.f32 %v564_v34, %v2068_v12  ;;  %v594_v47 = vsub.f32 %v564_v34, %v2070_v13  ;;  %v568_v50 = vrot.slane %v540_v45, %v2081_v18  ;;  %p1687_p1 = pnand %p1686_p11, %p1680_p0 }
  0xa8   : > { %v601_v31 = vand.u32 2147483647, %v585_v27  ;;  %v587_v32 = vsub.f32 %v552_v28, %v2068_v12  ;;  %v588_v33 = vsub.f32 %v552_v28, %v2070_v13  ;;  %v602_v37 = vand.u32 2147483647, %v586_v29 }
  0xa9   : > { %v589_v38 = vsub.f32 %v556_v30, %v2068_v12  ;;  %v590_v41 = vsub.f32 %v556_v30, %v2070_v13  ;;  %v560_v44 = vrot.slane %v543_v39, %v2081_v18  ;;  %v609_v48 = vand.u32 2147483647, %v593_v43 }
  0xaa   : > { %617 = vadd.xlane.f32.xlu0 %v601_v31  ;;  %v603_v36 = vand.u32 2147483647, %v587_v32  ;;  %v604_v40 = vand.u32 2147483647, %v588_v33  ;;  %v610_v52 = vand.u32 2147483647, %v594_v47  ;;  %v595_v55 = vsub.f32 %v568_v50, %v2068_v12 }
  0xab   : > { %v605_v42 = vand.u32 2147483647, %v589_v38  ;;  %v606_v46 = vand.u32 2147483647, %v590_v41  ;;  %v591_v49 = vsub.f32 %v560_v44, %v2068_v12  ;;  %v592_v53 = vsub.f32 %v560_v44, %v2070_v13 }
  0xac   : > { %621 = vadd.xlane.f32.xlu1 %v603_v36  ;;  %v572_v56 = vrot.slane %v542_v51, %v2081_v18  ;;  %v544_v57 = vcombine.high %v540_v45, %v540_v45  ;;  %v596_v59 = vsub.f32 %v568_v50, %v2070_v13  ;;  %v611_v60 = vand.u32 2147483647, %v595_v55 }
  0xad   : > { %v607_v54 = vand.u32 2147483647, %v591_v49  ;;  %v608_v58 = vand.u32 2147483647, %v592_v53 }
  0xae   : > { %619 = vadd.xlane.f32.xlu0 %v602_v37  ;;  %v597_v61 = vsub.f32 %v572_v56, %v2068_v12  ;;  %v576_v62 = vrot.slane %v544_v57, %v2081_v18  ;;  %v612_v63 = vand.u32 2147483647, %v596_v59  ;;  %v598_v0 = vsub.f32 %v572_v56, %v2070_v13 }
  0xb0   : > { %623 = vadd.xlane.f32.xlu1 %v604_v40  ;;  %v613_v1 = vand.u32 2147483647, %v597_v61  ;;  %v599_v2 = vsub.f32 %v576_v62, %v2068_v12  ;;  %v614_v3 = vand.u32 2147483647, %v598_v0  ;;  %v600_v4 = vsub.f32 %v576_v62, %v2070_v13 }
  0xb2   : > { %625 = vadd.xlane.f32.xlu0 %v605_v42  ;;  %v615_v6 = vand.u32 2147483647, %v599_v2  ;;  %v616_v7 = vand.u32 2147483647, %v600_v4 }
  0xb4   : > { %627 = vadd.xlane.f32.xlu1 %v606_v46 }
  0xb6   : > { %633 = vadd.xlane.f32.xlu0 %v609_v48 }
  0xb8   : > { %635 = vadd.xlane.f32.xlu1 %v610_v52 }
  0xba   : > { %629 = vadd.xlane.f32.xlu0 %v607_v54 }
  0xbc   : > { %631 = vadd.xlane.f32.xlu1 %v608_v58 }
  0xbe   : > { %637 = vadd.xlane.f32.xlu0 %v611_v60 }
  0xc0   : > { %639 = vadd.xlane.f32.xlu1 %v612_v63 }
  0xc2   : > { %641 = vadd.xlane.f32.xlu0 %v613_v1 }
  0xc4   : > { %643 = vadd.xlane.f32.xlu1 %v614_v3 }
  0xc6   : > { %645 = vadd.xlane.f32.xlu0 %v615_v6 }
  0xc8   : > { %647 = vadd.xlane.f32.xlu1 %v616_v7 }
  0xdc   : > { %890 = vperm.xlu0 %1479, %v888_v9  }
 0x137   : > { %v618_v12 = vpop.xlane.xlu0 %617 }
 0x138   : > { %v666_v16 = vmul.f32 %v2114_v11, %v618_v12 }
 0x139   : > { %v622_v13 = vpop.xlane.xlu1 %621 }
 0x13a   : > { %v1342_v17 = vmul.f32 -1.442695, %v666_v16  ;;  %v668_v19 = vmul.f32 %v2114_v11, %v622_v13 }
 0x13b   : > { %v620_v20 = vpop.xlane.xlu0 %619 }
 0x13c   : > { %1481 = vpow2.f32 %v1342_v17  ;;  %v1344_v21 = vmul.f32 -1.442695, %v668_v19  ;;  %v667_v22 = vmul.f32 %v2114_v11, %v620_v20 }
 0x13d   : > { %v624_v23 = vpop.xlane.xlu1 %623 }
 0x13e   : > { %1483 = vpow2.f32 %v1344_v21  ;;  %v1343_v24 = vmul.f32 -1.442695, %v667_v22  ;;  %v669_v25 = vmul.f32 %v2114_v11, %v624_v23 }
 0x13f   : > { %v626_v26 = vpop.xlane.xlu0 %625 }
 0x140   : > { %1485 = vpow2.f32 %v1343_v24  ;;  %v1345_v27 = vmul.f32 -1.442695, %v669_v25  ;;  %v670_v28 = vmul.f32 %v2114_v11, %v626_v26 }
 0x141   : > { %v628_v29 = vpop.xlane.xlu1 %627 }
 0x142   : > { %1487 = vpow2.f32 %v1345_v27  ;;  %v1346_v30 = vmul.f32 -1.442695, %v670_v28  ;;  %v671_v31 = vmul.f32 %v2114_v11, %v628_v29 }
 0x143   : > { %v634_v32 = vpop.xlane.xlu0 %633 }
 0x144   : > { %1489 = vpow2.f32 %v1346_v30  ;;  %v1347_v33 = vmul.f32 -1.442695, %v671_v31  ;;  %v674_v34 = vmul.f32 %v2114_v11, %v634_v32 }
 0x145   : > { %v636_v35 = vpop.xlane.xlu1 %635 }
 0x146   : > { %v1482_v36 = vpop.eup %1481  ;;  %1491 = vpow2.f32 %v1347_v33  ;;  %v675_v37 = vmul.f32 %v2114_v11, %v636_v35  ;;  %v1350_v38 = vmul.f32 -1.442695, %v674_v34 }
 0x147   : > { %v730_v39 = vadd.f32 1.0, %v1482_v36  ;;  %v630_v40 = vpop.xlane.xlu0 %629 }
 0x148   : > { %v1484_v41 = vpop.eup %1483  ;;  %v1351_v42 = vmul.f32 -1.442695, %v675_v37  ;;  %1493 = vpow2.f32 %v1350_v38  ;;  %v672_v43 = vmul.f32 %v2114_v11, %v630_v40 }
 0x149   : > { %1495 = vrcp.f32 %v730_v39  ;;  %v732_v44 = vadd.f32 1.0, %v1484_v41  ;;  %v632_v45 = vpop.xlane.xlu1 %631 }
 0x14a   : > { %v1486_v46 = vpop.eup %1485  ;;  %1497 = vpow2.f32 %v1351_v42  ;;  %v673_v47 = vmul.f32 %v2114_v11, %v632_v45  ;;  %v1348_v48 = vmul.f32 -1.442695, %v672_v43 }
 0x14b   : > { %1499 = vrcp.f32 %v732_v44  ;;  %v731_v49 = vadd.f32 1.0, %v1486_v46  ;;  %v638_v50 = vpop.xlane.xlu0 %637 }
 0x14c   : > { %v1488_v51 = vpop.eup %1487  ;;  %v1349_v52 = vmul.f32 -1.442695, %v673_v47  ;;  %1501 = vpow2.f32 %v1348_v48  ;;  %v676_v53 = vmul.f32 %v2114_v11, %v638_v50 }
 0x14d   : > { %1503 = vrcp.f32 %v731_v49  ;;  %v733_v54 = vadd.f32 1.0, %v1488_v51  ;;  %v640_v55 = vpop.xlane.xlu1 %639 }
 0x14e   : > { %v1490_v56 = vpop.eup %1489  ;;  %1505 = vpow2.f32 %v1349_v52  ;;  %v677_v57 = vmul.f32 %v2114_v11, %v640_v55  ;;  %v1352_v58 = vmul.f32 -1.442695, %v676_v53 }
 0x14f   : > { %1507 = vrcp.f32 %v733_v54  ;;  %v734_v59 = vadd.f32 1.0, %v1490_v56  ;;  %v642_v60 = vpop.xlane.xlu0 %641 }
 0x150   : > { %v1492_v61 = vpop.eup %1491  ;;  %v1353_v62 = vmul.f32 -1.442695, %v677_v57  ;;  %1509 = vpow2.f32 %v1352_v58  ;;  %v678_v63 = vmul.f32 %v2114_v11, %v642_v60 }
 0x151   : > { %1511 = vrcp.f32 %v734_v59  ;;  %v735_v0 = vadd.f32 1.0, %v1492_v61  ;;  %v644_v1 = vpop.xlane.xlu1 %643 }
 0x152   : > { %v1494_v2 = vpop.eup %1493  ;;  %1513 = vpow2.f32 %v1353_v62  ;;  %v679_v3 = vmul.f32 %v2114_v11, %v644_v1  ;;  %v1354_v4 = vmul.f32 -1.442695, %v678_v63 }
 0x153   : > { %v1496_v6 = vpop.eup %1495  ;;  %1515 = vrcp.f32 %v735_v0  ;;  %v738_v7 = vadd.f32 1.0, %v1494_v2  ;;  %v646_v8 = vpop.xlane.xlu0 %645 }
 0x154   : > { %v1498_v9 = vpop.eup %1497  ;;  %v1355_v12 = vmul.f32 -1.442695, %v679_v3  ;;  %1517 = vpow2.f32 %v1354_v4  ;;  %v680_v16 = vmul.f32 %v2114_v11, %v646_v8  ;;  %v799_v21 = vrot.slane %v1496_v6, %v2066_v10 }
 0x155   : > { %v1500_v13 = vpop.eup %1499  ;;  %v739_v17 = vadd.f32 1.0, %v1498_v9  ;;  %1519 = vrcp.f32 %v738_v7  ;;  %v648_v19 = vpop.xlane.xlu1 %647 }
 0x156   : > { %v1502_v20 = vpop.eup %1501  ;;  %1521 = vpow2.f32 %v1355_v12  ;;  %v681_v22 = vmul.f32 %v2114_v11, %v648_v19  ;;  %v1356_v23 = vmul.f32 -1.442695, %v680_v16  ;;  %v810_v27 = vrot.slane %v1500_v13, %v2066_v10  ;;  %v422_v13 = vld [vmem:[%s365_s22] sm:$0x1] }
 0x157   : > { %v1504_v24 = vpop.eup %1503  ;;  %1523 = vrcp.f32 %v739_v17  ;;  %v736_v25 = vadd.f32 1.0, %v1502_v20  ;;  %vm887_vm9 = vcmp.gt.f32.partialorder %v422_v13, 0.5 }
 0x158   : > { %v1506_v26 = vpop.eup %1505  ;;  %v804_v28 = vrot.slane %v1504_v24, %v2076_v15  ;;  %v1357_v29 = vmul.f32 -1.442695, %v681_v22  ;;  %1525 = vpow2.f32 %v1356_v23 }
 0x159   : > { %v1508_v30 = vpop.eup %1507  ;;  %v737_v31 = vadd.f32 1.0, %v1506_v26  ;;  %1527 = vrcp.f32 %v736_v25  ;;  %v893_v25 = vsel %vm887_vm9, 1, %v1795_v5 }
 0x15a   : > { %v1510_v32 = vpop.eup %1509  ;;  %v814_v33 = vrot.slane %v1508_v30, %v2076_v15  ;;  %1529 = vpow2.f32 %v1357_v29  ;;  %v806_v11 = vsel %vm805_vm2, %v804_v28, %v799_v21  ;;  %v493_v29 = vstv %s415_s12 }
 0x15b   : > { %v1512_v34 = vpop.eup %1511  ;;  %1531 = vrcp.f32 %v737_v31  ;;  %v740_v35 = vadd.f32 1.0, %v1510_v32  ;;  %v891_v28 = vpop.permute.xlu0 %890 }
 0x15c   : > { %v1514_v36 = vpop.eup %1513  ;;  %v819_v37 = vrot.slane %v1512_v34, %v2066_v10  ;;  %v815_v38 = vsel %vm805_vm2, %v814_v33, %v810_v27  ;;  %v897_v27 = vrot.slane %v893_v25, %v2081_v18  ;;  %vm892_vm12 = vcmp.eq.s32.totalorder %v891_v28, 1 }
 0x15d   : > { %v1516_v39 = vpop.eup %1515  ;;  %v741_v40 = vadd.f32 1.0, %v1514_v36  ;;  %1533 = vrcp.f32 %v740_v35  ;;  %v871_v41 = vsel %vm870_vm3, %v815_v38, %v806_v11 }
 0x15e   : > { %v1518_v42 = vpop.eup %1517  ;;  %v823_v43 = vrot.slane %v1516_v39, %v2076_v15  ;;  %vm898_vm11 = vcmp.eq.s32.totalorder %v897_v27, 1 }
 0x15f   : > { %v1520_v44 = vpop.eup %1519  ;;  %1535 = vrcp.f32 %v741_v40  ;;  %v742_v45 = vadd.f32 1.0, %v1518_v42  ;;  %vm899_vm13 = vmand %vm892_vm12, %vm898_vm11 }
 0x160   : > { %v1522_v46 = vpop.eup %1521  ;;  %v837_v47 = vrot.slane %v1520_v44, %v2066_v10  ;;  %v824_v48 = vsel %vm805_vm2, %v823_v43, %v819_v37 }
 0x161   : > { %v1524_v49 = vpop.eup %1523  ;;  %v743_v50 = vadd.f32 1.0, %v1522_v46  ;;  %1537 = vrcp.f32 %v742_v45  ;;  %v873_v51 = vsel %vm872_vm4, %v824_v48, %v871_v41 }
 0x162   : > { %v1526_v52 = vpop.eup %1525  ;;  %v841_v53 = vrot.slane %v1524_v49, %v2076_v15 }
 0x163   : > { %v1528_v54 = vpop.eup %1527  ;;  %1539 = vrcp.f32 %v743_v50  ;;  %v744_v55 = vadd.f32 1.0, %v1526_v52 }
 0x164   : > { %v1530_v56 = vpop.eup %1529  ;;  %v828_v57 = vrot.slane %v1528_v54, %v2066_v10  ;;  %v842_v58 = vsel %vm805_vm2, %v841_v53, %v837_v47 }
 0x165   : > { %v1532_v59 = vpop.eup %1531  ;;  %v745_v60 = vadd.f32 1.0, %v1530_v56  ;;  %1541 = vrcp.f32 %v744_v55 }
 0x166   : > { %v832_v61 = vrot.slane %v1532_v59, %v2076_v15 }
 0x167   : > { %v1534_v62 = vpop.eup %1533  ;;  %1543 = vrcp.f32 %v745_v60 }
 0x168   : > { %v833_v63 = vsel %vm805_vm2, %v832_v61, %v828_v57  ;;  %v846_v0 = vrot.slane %v1534_v62, %v2066_v10 }
 0x169   : > { %v1536_v1 = vpop.eup %1535  ;;  %v875_v2 = vsel %vm874_vm5, %v833_v63, %v873_v51 }
 0x16a   : > { %v850_v3 = vrot.slane %v1536_v1, %v2076_v15  ;;  %v877_v4 = vsel %vm876_vm6, %v842_v58, %v875_v2 }
 0x16b   : > { %v1538_v6 = vpop.eup %1537 }
 0x16c   : > { %v851_v7 = vsel %vm805_vm2, %v850_v3, %v846_v0  ;;  %v855_v8 = vrot.slane %v1538_v6, %v2066_v10 }
 0x16d   : > { %v1540_v9 = vpop.eup %1539  ;;  %v879_v12 = vsel %vm878_vm7, %v851_v7, %v877_v4 }
 0x16e   : > { %v859_v16 = vrot.slane %v1540_v9, %v2076_v15 }
 0x16f   : > { %v1542_v17 = vpop.eup %1541 }
 0x170   : > { %v860_v19 = vsel %vm805_vm2, %v859_v16, %v855_v8  ;;  %v864_v20 = vrot.slane %v1542_v17, %v2066_v10 }
 0x171   : > { %v1544_v21 = vpop.eup %1543  ;;  %v881_v22 = vsel %vm880_vm8, %v860_v19, %v879_v12 }
 0x172   : > { %v868_v23 = vrot.slane %v1544_v21, %v2076_v15 }
 0x174   : > { %v869_v24 = vsel %vm805_vm2, %v868_v23, %v864_v20 }
 0x175   : > { %v883_v26 = vsel %vm882_vm10, %v869_v24, %v881_v22 }
 0x177   : > { %v489_v30 = vpop.f32.mrb[0].mxu0 }
 0x178   : > { %v494_v10 = vmul.f32 %v493_v29, %v489_v30  ;;  %v1385_v31 = vpop.f32.mrb[1].mxu0 }
 0x17a   : > { %v885_v32 = vmul.f32 %v883_v26, %v494_v10 }
 0x17c   : > { %v900_v33 = vsel %vm899_vm13, %v885_v32, 0.0 }
 0x17d   : > { %987 = vxpose.xlu1.b32.start.end [1/1] (short) (narrow) %v900_v33, 16  ;;  %v902_v15 = vsel %vm901_vm14, %v900_v33, -inf }
 0x17e   : > { %903 = vmax.xlane.f32.xlu0 %v902_v15 }
 0x1fd   : > { %v1003_v5 = vpop.trf.xlu1 }
 0x1fe   : > { %v1020_v11 = vsel %vm1019_vm15, %v1003_v5, -inf }
 0x1ff   : > { %1021 = vmax.xlane.f32.xlu1 %v1020_v11 }
 0x201   : > { %v1004_v18 = vpop.trf.xlu1 }
 0x202   : > { %v1023_v34 = vsel %vm1019_vm15, %v1004_v18, -inf }
 0x203   : > { %1024 = vmax.xlane.f32.xlu0 %v1023_v34 }
 0x20b   : > { %v904_v35 = vpop.xlane.xlu0 %903 }
 0x20c   : > { %v905_v36 = vsub.f32 %v900_v33, %v904_v35 }
 0x20e   : > { %v906_v37 = vmul.f32 1.442695, %v905_v36 }
 0x210   : > { %1545 = vpow2.f32 %v906_v37 }
 0x21a   : > { %v1546_v38 = vpop.eup %1545 }
 0x21b   : > { %v908_v39 = vsel %vm901_vm14, %v1546_v38, 0.0 }
 0x21c   : > { %909 = vadd.xlane.f32.xlu0 %v908_v39 }
 0x28c   : > { %v1022_v40 = vpop.xlane.xlu1 %1021 }
 0x28d   : > { %v1026_v41 = vsub.f32 %v1003_v5, %v1022_v40 }
 0x28f   : > { %v1028_v42 = vmul.f32 1.442695, %v1026_v41 }
 0x290   : > { %v1025_v43 = vpop.xlane.xlu0 %1024 }
 0x291   : > { %1547 = vpow2.f32 %v1028_v42  ;;  %v1027_v44 = vsub.f32 %v1004_v18, %v1025_v43 }
 0x293   : > { %v1030_v45 = vmul.f32 1.442695, %v1027_v44 }
 0x295   : > { %1549 = vpow2.f32 %v1030_v45 }
 0x29b   : > { %v1548_v46 = vpop.eup %1547 }
 0x29c   : > { %v1032_v47 = vsel %vm1019_vm15, %v1548_v46, 0.0 }
 0x29d   : > { %1033 = vadd.xlane.f32.xlu0 %v1032_v47 }
 0x29f   : > { %v1550_v48 = vpop.eup %1549 }
 0x2a0   : > { %v1035_v49 = vsel %vm1019_vm15, %v1550_v48, 0.0 }
 0x2a1   : > { %1036 = vadd.xlane.f32.xlu0 %v1035_v49 }
 0x2a9   : > { %v910_v50 = vpop.xlane.xlu0 %909 }
 0x2aa   : > { %1551 = vrcp.f32 %v910_v50 }
 0x2b4   : > { %v1552_v51 = vpop.eup %1551 }
 0x2b5   : > { %v912_v52 = vmul.f32 %v1552_v51, %v1546_v38 }
 0x2b7   : > { %1391 = vmatmul.mubr.msk.f32.vlgmr.msra.gmra.mrb[0].mxu1 %vm901_vm14, %v912_v52 }
 0x2b8   : > { %1394 = vmatpush3.msra.mxu1 %v2074_v14 }
 0x32a   : > { %v1034_v53 = vpop.xlane.xlu0 %1033 }
 0x32b   : > { %1553 = vrcp.f32 %v1034_v53 }
 0x32e   : > { %v1037_v54 = vpop.xlane.xlu0 %1036 }
 0x32f   : > { %1555 = vrcp.f32 %v1037_v54 }
 0x335   : > { %v1554_v55 = vpop.eup %1553 }
 0x336   : > { %v1039_v56 = vmul.f32 %v1554_v55, %v1548_v46 }
 0x338   : > { %1395 = vmatprep.mubr.msk.f32.mxu1 %vm1019_vm15, %v1039_v56 }
 0x339   : > { %v1556_v57 = vpop.eup %1555 }
 0x33a   : > { %v1041_v58 = vmul.f32 %v1556_v57, %v1550_v48 }
 0x33c   : > { %1396 = vmatmul.mubr.msk.f32.vlgmr.msra.gmra.mrb[2].mxu1 %vm1019_vm15, %v1041_v58 }
 0x38a   : > { %v982_v59 = vpop.f32.mrb[0].mxu1 }
 0x38b   : > { %986 = vst [vmem:[%s407_s16] sm:$0xff] %v982_v59  ;;  %v1392_v60 = vpop.f32.mrb[1].mxu1 }
 0x38c   : > { %1690 = shalt.err (!%p1687_p1)
}
 0x38d   : > { %s1691_s18 = scalar_lea.hbm %s1142_s26, 128  ;;  %s1695_s19 = scalar_lea.hbm %s2252_s6, 256 }
 0x38e   : > { %p1692_p10 = scmp.ne.s32.totalorder %s1142_s26, %s1691_s18  ;;  %p1696_p9 = scmp.lt.u32.totalorder %s1142_s26, %s2252_s6 }
 0x38f   : > { %p1697_p5 = scmp.lt.u32.totalorder %s1695_s19, %s1691_s18  ;;  %p1699_p3 = scmp.lt.u32.totalorder %s1691_s18, %s1142_s26 }
 0x390   : > { %p1693_p4 = pnand %p1692_p10, %p2277_p6 }
 0x391   : > { %p1698_p2 = por %p1697_p5, %p1696_p9 }
 0x392   : > { %p1694_p7 = pneg %p1693_p4 }
 0x393   : > { %p1700_p12 = por %p1699_p3, %p1698_p2 }
 0x395   : > { %p1701_p0 = pnand %p1700_p12, %p1694_p7 }
 0x397   : > { %1704 = shalt.err (!%p1701_p0)
}
 0x398   : > { %1412 = dma.vmem_to_hbm [thread:$0]  (%p2277_p6), %s2171_s23, 128, %s1142_s26, %s1126_s17  }
 0x399   : > { %s414_s24 = scalar_lea.vmem [#allocation13], %s1338_s21  ;;  %s1369_s11 = sshll.u32 %s1867_s1, 8 }
 0x39a   : > { %s1157_s25 = sshll.u32 %s414_s24, 4  ;;  %s2202_s20 = scalar_lea.hbm %s2253_s7, %s1369_s11  ;;  %s2197_s25 = int_to_ptr.vmem [resolvable:$true] %s1157_s25 }
 0x39b   : > { %s1131_s27 = scalar_lea.sflag [#allocation14], %s2039_s8  ;;  %s1705_s23 = scalar_lea.vmem %s2197_s25, 256 }
 0x39c   : > { %p1706_p8 = scmp.ne.s32.totalorder %s2197_s25, %s1705_s23  ;;  %s1797_s1 = smov [#allocation13]  }
 0x39d   : > { %s1709_s21 = sshll.u32 %s1797_s1, 4  ;;  %s1710_s21 = int_to_ptr.vmem [resolvable:$false] %s1709_s21 }
 0x39e   : > { %p1707_p13 = pnand %p1706_p8, %p2277_p6  ;;  %s1711_s26 = scalar_lea.vmem %s1710_s21, 512 }
 0x39f   : > { %p1712_p1 = scmp.lt.s32.totalorder %s2197_s25, %s1710_s21  ;;  %p1713_p10 = scmp.lt.s32.totalorder %s1711_s26, %s1705_s23 }
 0x3a0   : > { %p1708_p11 = pneg %p1707_p13 }
 0x3a1   : > { %p1714_p4 = por %p1713_p10, %p1712_p1 }
 0x3a3   : > { %p1715_p7 = pnand %p1714_p4, %p1708_p11 }
 0x40f   : > { %v1397_v14 = vpop.f32.mrb[2].mxu1 }
 0x410   : > { %1124 = vst [vmem:[%s414_s24 + $0x8] sm:$0xff] %v1397_v14  ;;  %v1114_v61 = vpop.f32.mrb[3].mxu1 }
 0x411   : > { %1123 = vst [vmem:[%s414_s24] sm:$0xff] %v1114_v61 }
 0x412   : > { %1718 = shalt.err (!%p1715_p7)
}
 0x413   : > { %s1719_s17 = scalar_lea.hbm %s2202_s20, 256  ;;  %s1723_s13 = scalar_lea.hbm %s2253_s7, 512 }
 0x414   : > { %p1720_p9 = scmp.ne.s32.totalorder %s2202_s20, %s1719_s17  ;;  %p1724_p3 = scmp.lt.u32.totalorder %s2202_s20, %s2253_s7 }
 0x415   : > { %p1725_p12 = scmp.lt.u32.totalorder %s1723_s13, %s1719_s17  ;;  %p1727_p8 = scmp.lt.u32.totalorder %s1719_s17, %s2202_s20 }
 0x416   : > { %p1721_p5 = pnand %p1720_p9, %p2277_p6 }
 0x417   : > { %p1726_p0 = por %p1725_p12, %p1724_p3 }
 0x418   : > { %p1722_p2 = pneg %p1721_p5 }
 0x419   : > { %p1728_p13 = por %p1727_p8, %p1726_p0 }
 0x41b   : > { %p1729_p11 = pnand %p1728_p13, %p1722_p2 }
 0x41d   : > { %1732 = shalt.err (!%p1729_p11)
}
 0x41e   : > { %s1798_s16 = smov 128   ;;  %s1799_s24 = smov 8  }
 0x41f   : > { %1413 = dma.vmem_to_hbm [thread:$0]  (%p2277_p6), %s2197_s25, 256, %s2202_s20, %s1131_s27, %s1798_s16, %s1798_s16, %s1799_s24  }
 0x420 PF: > { %s1172_s11 = sand.u32 1, %s1771_s28   ;;  %p2278_p1 = scmp.ne.s32.totalorder %s2264_s15, 0 }
 0x421   : > { %p2279_p10 = scmp.ge.s32.totalorder %s1783_s0, 2  ;;  %s1173_s10 = scalar_lea.sflag [#allocation6], %s1172_s11 }
 0x423   : > { %p1430_p4 = pnand %p2279_p10, %p2278_p1 }
 0x425   : > { %1762 = dma.done.wait (!%p1430_p4), %s1173_s10, 128  }
 0x426   : > { %1764 = vsyncadd (!%p1430_p4), %s1173_s10, 4294967168  ;;  %s1182_s3 = scalar_lea.sflag [#allocation14], %s1172_s11 }
 0x427   : > { %1766 = dma.done.wait (!%p1430_p4), %s1182_s3, 256  }
 0x428   : > { %1768 = vsyncadd (!%p1430_p4), %s1182_s3, 4294967040  ;;  %s2280_s14 = sld [smem:[#allocation20_spill]]  ;;  %p32_p6 = scmp.ge.s32.totalorder %s1871_s9, 4  }
 0x429   : > { %s2281_s28 = smov %s1775_s29  ;;  %s2282_s29 = smov %s1779_s30 }
 0x42a   : > { %s2284_s0 = smov %s1871_s9  ;;  %34 = sbr.rel (!%p32_p6) target bundleno = 15 (0xf), region = 143 }
 0x42e   : > { %s2283_s30 = smov %s2280_s14 }
 0x431   :  { %1187 = vsyncpa [#allocation5], 1 }
 0x432   :  { %1189 = vsyncpa [#allocation5 + $0x1], 1 }
 0x433   :  { %1190 = vsyncpa [#allocation8], 1 }
 0x434   :  { %1192 = vsyncpa [#allocation8 + $0x1], 1 }
 0x435   :  { %1193 = vsyncpa [#allocation11], 1 }
 0x436   :  { %1195 = vsyncpa [#allocation11 + $0x1], 1 }
 0x437   :  { %1196 = vsyncpa [#allocation6], 1 }
 0x438   :  { %1198 = vsyncpa [#allocation6 + $0x1], 1 }
 0x439   :  { %1199 = vsyncpa [#allocation14], 1 }
 0x43a   :  { %1201 = vsyncpa [#allocation14 + $0x1], 1 }

</bundles_post_ra>
